<compile_context>
chip_gen: v7x
topology: tpu7x:2x2x1
jax: 0.10.0
libtpu: 0.0.40
codegen_flags: <defaults>
</compile_context>

<pallas_src>
import functools

import jax
import jax.numpy as jnp
from jax import lax
from jax.experimental import pallas as pl
from jax.experimental.pallas import tpu as pltpu


def _round_up(n, m):
    return ((n + m - 1) // m) * m


def rnn_classify_kernel(ids_ref, w_ref, o_ref, *, seq_len, batch, vocab_size,
                        vector_dim, num_classes, row_whh, row_wcls, row_bcls):
    """Fused Embedding -> RNN(tanh) -> last-step Linear.

    ids_ref : (T*B, 1) int32    token ids, time-major flattened (row = t*B + b)
    w_ref   : (P, 128) float32  packed parameters:
                rows [0, V)                  lanes [0, D) : emb @ W_ih^T + (b_ih + b_hh)
                rows [row_whh,  row_whh+D)   lanes [0, D) : W_hh^T
                rows [row_wcls, row_wcls+D)  lanes [0, C) : W_cls^T
                row   row_bcls               lanes [0, C) : b_cls
    o_ref   : (B, C) float32    logits
    """
    T, B = seq_len, batch
    V, D, C = vocab_size, vector_dim, num_classes
    TB = T * B

    # ---- Carve the single packed parameter buffer (static slices: zero runtime cost).
    emb_proj = w_ref[0:V, 0:D]                       # (V, D)
    whh = w_ref[row_whh:row_whh + D, 0:D]            # (D, D)  = W_hh^T
    wcls = w_ref[row_wcls:row_wcls + D, 0:C]         # (D, C)  = W_cls^T
    bcls = w_ref[row_bcls:row_bcls + 1, 0:C]         # (1, C)

    # ---- In-kernel embedding gather as a one-hot matmul.  The input projection and
    #      both biases are already folded into emb_proj, so this single matmul yields
    #      x_t @ W_ih^T + b_ih + b_hh for every (t, b) at once (off the serial chain).
    ids = ids_ref[...]                                               # (TB, 1)
    one_hot = (ids == lax.broadcasted_iota(jnp.int32, (TB, V), 1)
               ).astype(jnp.float32)                                 # (TB, V)
    xw = jnp.dot(one_hot, emb_proj,
                 preferred_element_type=jnp.float32)                 # (TB, D)

    # ---- Recurrence: only h @ W_hh^T remains on the serial critical path; h lives
    #      in vregs, loop fully unrolled (T is static and tiny).
    h = jnp.zeros((B, D), jnp.float32)
    for t in range(T):
        x_t = xw[t * B:(t + 1) * B, :]                               # (B, D) static slice
        h = jnp.tanh(x_t + jnp.dot(h, whh,
                                   preferred_element_type=jnp.float32))

    # ---- Classifier on the last hidden state (C = 9 -> a single masked store, fine).
    o_ref[...] = (jnp.dot(h, wcls, preferred_element_type=jnp.float32)
                  + bcls).astype(o_ref.dtype)


def torch_model_forward(x_ids, params):
    """Equivalent of TorchModel.forward(x) for the inference path (y=None)."""
    emb = params["embedding"]                        # (V, D)
    V, D = emb.shape
    B, T = x_ids.shape
    C = params["b_cls"].shape[-1]

    # Fold the input projection + both biases into the embedding table.  Depends only
    # on params -> trivially cheap (27x32 @ 32x32) and constant-foldable under jit.
    emb_proj = (jnp.dot(emb, params["w_ih"].T, precision=lax.Precision.HIGHEST)
                + (params["b_ih"] + params["b_hh"]))                 # (V, D)

    # Pack all float params into one 128-lane, 8-sublane-padded buffer -> one DMA.
    row_whh = _round_up(V, 8)
    row_wcls = row_whh + _round_up(D, 8)
    row_bcls = row_wcls + _round_up(D, 8)
    n_rows = _round_up(row_bcls + 1, 8)
    packed = jnp.zeros((n_rows, 128), jnp.float32)
    packed = packed.at[0:V, 0:D].set(emb_proj)
    packed = packed.at[row_whh:row_whh + D, 0:D].set(params["w_hh"].T)
    packed = packed.at[row_wcls:row_wcls + D, 0:C].set(params["w_cls"].T)
    packed = packed.at[row_bcls, 0:C].set(params["b_cls"])

    # Only the tiny int id array is rearranged in glue (time-major flat ids, ~256 B).
    ids_tb = x_ids.astype(jnp.int32).T.reshape(T * B, 1)

    kernel = functools.partial(
        rnn_classify_kernel, seq_len=T, batch=B, vocab_size=V, vector_dim=D,
        num_classes=C, row_whh=row_whh, row_wcls=row_wcls, row_bcls=row_bcls)

    return pl.pallas_call(
        kernel,
        out_shape=jax.ShapeDtypeStruct((B, C), jnp.float32),
        # No grid: working set ~70 KiB << VMEM on every generation (incl. v7x 64 MiB);
        # whole-array VMEM blocks, exactly two input DMAs (ids + packed params).
        in_specs=[pl.BlockSpec(memory_space=pltpu.MemorySpace.VMEM),
                  pl.BlockSpec(memory_space=pltpu.MemorySpace.VMEM)],
        out_specs=pl.BlockSpec(memory_space=pltpu.MemorySpace.VMEM),
    )(ids_tb, packed)


def reference_forward(x_ids, params):
    """Pure-JAX reference reproducing nn.Embedding -> nn.RNN(batch_first) -> Linear."""
    hp = lax.Precision.HIGHEST
    x = jnp.take(params["embedding"], x_ids, axis=0)       # (B, T, D)
    B, T, D = x.shape
    h = jnp.zeros((B, D), jnp.float32)
    for t in range(T):
        h = jnp.tanh(jnp.dot(x[:, t, :], params["w_ih"].T, precision=hp)
                     + params["b_ih"]
                     + jnp.dot(h, params["w_hh"].T, precision=hp)
                     + params["b_hh"])
    return jnp.dot(h, params["w_cls"].T, precision=hp) + params["b_cls"]


def make_params(key, vocab_size, vector_dim, sentence_length):
    ks = jax.random.split(key, 6)
    C = sentence_length + 1
    s = 0.1
    return {
        "embedding": s * jax.random.normal(ks[0], (vocab_size, vector_dim), jnp.float32),
        "w_ih": s * jax.random.normal(ks[1], (vector_dim, vector_dim), jnp.float32),
        "w_hh": s * jax.random.normal(ks[2], (vector_dim, vector_dim), jnp.float32),
        "b_ih": s * jax.random.normal(ks[3], (vector_dim,), jnp.float32),
        "b_hh": s * jax.random.normal(ks[4], (vector_dim,), jnp.float32),
        "w_cls": s * jax.random.normal(ks[5], (C, vector_dim), jnp.float32),
        "b_cls": jnp.zeros((C,), jnp.float32),
    }


if __name__ == "__main__":
    vector_dim = 32
    sentence_length = 8
    vocab_size = 27            # e.g. 'a'-'z' + pad, as implied by the homework
    batch = 8

    key = jax.random.PRNGKey(0)
    k_params, k_ids = jax.random.split(key)
    params = make_params(k_params, vocab_size, vector_dim, sentence_length)
    x_ids = jax.random.randint(k_ids, (batch, sentence_length), 0, vocab_size,
                               dtype=jnp.int32)

    y_pred = jax.jit(torch_model_forward)(x_ids, params)
    y_pred = jax.block_until_ready(y_pred)

    y_ref = reference_forward(x_ids, params)
    assert y_pred.shape == (batch, sentence_length + 1)
    assert jnp.allclose(y_pred, y_ref, atol=1e-4, rtol=1e-4), (
        float(jnp.max(jnp.abs(y_pred - y_ref))))

    print("KERNEL_OK")
</pallas_src>

<mosaic_0001>
module attributes {stable_mosaic.version = 11 : i64} {
  func.func @rnn_classify_kernel(%arg0: memref<64x1xi32, #tpu.memory_space<vmem>>, %arg1: memref<104x128xf32, #tpu.memory_space<vmem>>, %arg2: memref<8x9xf32, #tpu.memory_space<vmem>>) attributes {dimension_semantics = [], scalar_prefetch = 0 : i64, scratch_operands = 0 : i64, tpu.core_type = #tpu.core_type<tc>} {
    %c0 = arith.constant 0 : index
    %c0_0 = arith.constant 0 : index
    %0 = vector.load %arg1[%c0, %c0_0] : memref<104x128xf32, #tpu.memory_space<vmem>>, vector<27x32xf32>
    %c32 = arith.constant 32 : index
    %c0_1 = arith.constant 0 : index
    %1 = vector.load %arg1[%c32, %c0_1] : memref<104x128xf32, #tpu.memory_space<vmem>>, vector<32x32xf32>
    %c64 = arith.constant 64 : index
    %c0_2 = arith.constant 0 : index
    %2 = vector.load %arg1[%c64, %c0_2] : memref<104x128xf32, #tpu.memory_space<vmem>>, vector<32x9xf32>
    %c96 = arith.constant 96 : index
    %c0_3 = arith.constant 0 : index
    %3 = vector.load %arg1[%c96, %c0_3] : memref<104x128xf32, #tpu.memory_space<vmem>>, vector<1x9xf32>
    %c0_4 = arith.constant 0 : index
    %c0_5 = arith.constant 0 : index
    %4 = vector.load %arg0[%c0_4, %c0_5] : memref<64x1xi32, #tpu.memory_space<vmem>>, vector<64x1xi32>
    %5 = tpu.iota {dimensions = array<i32: 1>} : vector<64x27xi32>
    %6 = vector.broadcast %4 : vector<64x1xi32> to vector<64x27xi32>
    %7 = arith.cmpi eq, %6, %5 : vector<64x27xi32>
    %8 = arith.extui %7 : vector<64x27xi1> to vector<64x27xi32>
    %9 = arith.sitofp %8 : vector<64x27xi32> to vector<64x27xf32>
    %cst = arith.constant dense<0.000000e+00> : vector<64x32xf32>
    %10 = tpu.matmul %9, %0, %cst {dimension_numbers = #tpu.dot_dimension_numbers<[1], [0], [0], [1], [0, 0, 1, 1], [], []>} : vector<64x27xf32>, vector<27x32xf32>, vector<64x32xf32> -> vector<64x32xf32>
    %cst_6 = arith.constant 0.000000e+00 : f32
    %11 = vector.broadcast %cst_6 : f32 to vector<8x32xf32>
    %12 = vector.extract_strided_slice %10 {offsets = [0, 0], sizes = [8, 32], strides = [1, 1]} : vector<64x32xf32> to vector<8x32xf32>
    %cst_7 = arith.constant dense<0.000000e+00> : vector<8x32xf32>
    %13 = tpu.matmul %11, %1, %cst_7 {dimension_numbers = #tpu.dot_dimension_numbers<[1], [0], [0], [1], [0, 0, 1, 1], [], []>} : vector<8x32xf32>, vector<32x32xf32>, vector<8x32xf32> -> vector<8x32xf32>
    %14 = arith.addf %12, %13 : vector<8x32xf32>
    %15 = math.tanh %14 : vector<8x32xf32>
    %16 = vector.extract_strided_slice %10 {offsets = [8, 0], sizes = [8, 32], strides = [1, 1]} : vector<64x32xf32> to vector<8x32xf32>
    %cst_8 = arith.constant dense<0.000000e+00> : vector<8x32xf32>
    %17 = tpu.matmul %15, %1, %cst_8 {dimension_numbers = #tpu.dot_dimension_numbers<[1], [0], [0], [1], [0, 0, 1, 1], [], []>} : vector<8x32xf32>, vector<32x32xf32>, vector<8x32xf32> -> vector<8x32xf32>
    %18 = arith.addf %16, %17 : vector<8x32xf32>
    %19 = math.tanh %18 : vector<8x32xf32>
    %20 = vector.extract_strided_slice %10 {offsets = [16, 0], sizes = [8, 32], strides = [1, 1]} : vector<64x32xf32> to vector<8x32xf32>
    %cst_9 = arith.constant dense<0.000000e+00> : vector<8x32xf32>
    %21 = tpu.matmul %19, %1, %cst_9 {dimension_numbers = #tpu.dot_dimension_numbers<[1], [0], [0], [1], [0, 0, 1, 1], [], []>} : vector<8x32xf32>, vector<32x32xf32>, vector<8x32xf32> -> vector<8x32xf32>
    %22 = arith.addf %20, %21 : vector<8x32xf32>
    %23 = math.tanh %22 : vector<8x32xf32>
    %24 = vector.extract_strided_slice %10 {offsets = [24, 0], sizes = [8, 32], strides = [1, 1]} : vector<64x32xf32> to vector<8x32xf32>
    %cst_10 = arith.constant dense<0.000000e+00> : vector<8x32xf32>
    %25 = tpu.matmul %23, %1, %cst_10 {dimension_numbers = #tpu.dot_dimension_numbers<[1], [0], [0], [1], [0, 0, 1, 1], [], []>} : vector<8x32xf32>, vector<32x32xf32>, vector<8x32xf32> -> vector<8x32xf32>
    %26 = arith.addf %24, %25 : vector<8x32xf32>
    %27 = math.tanh %26 : vector<8x32xf32>
    %28 = vector.extract_strided_slice %10 {offsets = [32, 0], sizes = [8, 32], strides = [1, 1]} : vector<64x32xf32> to vector<8x32xf32>
    %cst_11 = arith.constant dense<0.000000e+00> : vector<8x32xf32>
    %29 = tpu.matmul %27, %1, %cst_11 {dimension_numbers = #tpu.dot_dimension_numbers<[1], [0], [0], [1], [0, 0, 1, 1], [], []>} : vector<8x32xf32>, vector<32x32xf32>, vector<8x32xf32> -> vector<8x32xf32>
    %30 = arith.addf %28, %29 : vector<8x32xf32>
    %31 = math.tanh %30 : vector<8x32xf32>
    %32 = vector.extract_strided_slice %10 {offsets = [40, 0], sizes = [8, 32], strides = [1, 1]} : vector<64x32xf32> to vector<8x32xf32>
    %cst_12 = arith.constant dense<0.000000e+00> : vector<8x32xf32>
    %33 = tpu.matmul %31, %1, %cst_12 {dimension_numbers = #tpu.dot_dimension_numbers<[1], [0], [0], [1], [0, 0, 1, 1], [], []>} : vector<8x32xf32>, vector<32x32xf32>, vector<8x32xf32> -> vector<8x32xf32>
    %34 = arith.addf %32, %33 : vector<8x32xf32>
    %35 = math.tanh %34 : vector<8x32xf32>
    %36 = vector.extract_strided_slice %10 {offsets = [48, 0], sizes = [8, 32], strides = [1, 1]} : vector<64x32xf32> to vector<8x32xf32>
    %cst_13 = arith.constant dense<0.000000e+00> : vector<8x32xf32>
    %37 = tpu.matmul %35, %1, %cst_13 {dimension_numbers = #tpu.dot_dimension_numbers<[1], [0], [0], [1], [0, 0, 1, 1], [], []>} : vector<8x32xf32>, vector<32x32xf32>, vector<8x32xf32> -> vector<8x32xf32>
    %38 = arith.addf %36, %37 : vector<8x32xf32>
    %39 = math.tanh %38 : vector<8x32xf32>
    %40 = vector.extract_strided_slice %10 {offsets = [56, 0], sizes = [8, 32], strides = [1, 1]} : vector<64x32xf32> to vector<8x32xf32>
    %cst_14 = arith.constant dense<0.000000e+00> : vector<8x32xf32>
    %41 = tpu.matmul %39, %1, %cst_14 {dimension_numbers = #tpu.dot_dimension_numbers<[1], [0], [0], [1], [0, 0, 1, 1], [], []>} : vector<8x32xf32>, vector<32x32xf32>, vector<8x32xf32> -> vector<8x32xf32>
    %42 = arith.addf %40, %41 : vector<8x32xf32>
    %43 = math.tanh %42 : vector<8x32xf32>
    %cst_15 = arith.constant dense<0.000000e+00> : vector<8x9xf32>
    %44 = tpu.matmul %43, %2, %cst_15 {dimension_numbers = #tpu.dot_dimension_numbers<[1], [0], [0], [1], [0, 0, 1, 1], [], []>} : vector<8x32xf32>, vector<32x9xf32>, vector<8x9xf32> -> vector<8x9xf32>
    %45 = vector.broadcast %3 : vector<1x9xf32> to vector<8x9xf32>
    %46 = arith.addf %44, %45 : vector<8x9xf32>
    %c0_16 = arith.constant 0 : index
    %c0_17 = arith.constant 0 : index
    %47 = vector.load %arg2[%c0_16, %c0_17] : memref<8x9xf32, #tpu.memory_space<vmem>>, vector<8x9xf32>
    tpu.vector_store %arg2[%c0_16, %c0_17], %46 {strides = array<i32>} : memref<8x9xf32, #tpu.memory_space<vmem>>, vector<8x9xf32>,
    return
  }
}

</mosaic_0001>

<bundles_post_ra>
// kernel: torch_model_forward.1
= control target key start
LH: loop header
LB: loop body
LE: loop exit
PB: predicated region body
PF: predicated region fallthrough
CT: control target
= control target key end

     0   :  { %v1225_v2 = vmov 0   ;;  %vm108_vm0 = vcmask 1042432   ;;  %v1226_v8 = vmov 0.0|0.0   ;;  %vm1227_vm1 = vmmov 1   ;;  %s1413_s0 = inlined_call_operand.vmem [shape: s32[64,1], index: 0, kind: input, shape index: {}]   ;;  %s1414_s1 = inlined_call_operand.vmem [shape: f32[104,128], index: 1, kind: input, shape index: {}]   ;;  %s1415_s2 = inlined_call_operand.hbm [shape: f32[8,9], index: 2, kind: output, shape index: {}]  }
   0x1   :  { %v25_v0 = vld [vmem:[%s1413_s0] sm:$0xff]  ;;  %v27_v1 = vld [vmem:[%s1413_s0 + $0x10] sm:$0xff]  ;;  %1183 = vset.pattern.permute.xlu0 %v1225_v2  ;;  %1184 = vset.pattern.permute.xlu1 %v1225_v2  ;;  %v26_v3 = vld [vmem:[%s1413_s0 + $0x8] sm:$0xff] }
   0x2   :  { %36 = vperm.xlu0 %1183, %v25_v0   ;;  %42 = vperm.xlu1 %1184, %v27_v1   ;;  %v28_v4 = vld [vmem:[%s1413_s0 + $0x18] sm:$0xff]  ;;  %v12_v5 = vld [vmem:[%s1414_s1] sm:$0xff]  ;;  %v13_v6 = vld [vmem:[%s1414_s1 + $0x8] sm:$0xff] }
   0x3   :  { %v1113_v7 = vpack.c.bf16 %v13_v6, %v12_v5  ;;  %1123 = vmatprep.subr.bf16.mxu1 %v1226_v8  ;;  %v16_v9 = vld [vmem:[%s1414_s1 + $0x20] sm:$0xff]  ;;  %v17_v10 = vld [vmem:[%s1414_s1 + $0x28] sm:$0xff]  ;;  %v14_v11 = vld [vmem:[%s1414_s1 + $0x10] sm:$0xff] }
   0x4   :  { %v1274_v12 = vpack.c.bf16 %v17_v10, %v16_v9  ;;  %v15_v13 = vld [vmem:[%s1414_s1 + $0x18] sm:$0x7]  ;;  %vm1279_vm2 = vmpackc.low %vm108_vm0, %vm1227_vm1  ;;  %v18_v15 = vld [vmem:[%s1414_s1 + $0x30] sm:$0xff] }
   0x5   :  { %1114 = vmatprep.subr.bf16.mxu0 %v1113_v7  ;;  %v1117_v16 = vpack.c.bf16 %v15_v13, %v14_v11  ;;  %v19_v17 = vld [vmem:[%s1414_s1 + $0x38] sm:$0xff] }
   0x6   :  { %7 = vsyncpa [#allocation3], 0  ;;  %39 = vperm.xlu0 %1183, %v26_v3   ;;  %45 = vperm.xlu1 %1184, %v28_v4   ;;  %v29_v18 = vld [vmem:[%s1413_s0 + $0x20] sm:$0xff]  ;;  %v30_v19 = vld [vmem:[%s1413_s0 + $0x28] sm:$0xff]  ;;  %v1296_v20 = vpack.c.bf16 %v19_v17, %v18_v15  ;;  %vm1228_vm3 = vmmov 0   ;;  %v1229_v21 = vmov 0.0   ;;  %v33_v23 = vlaneseq }
   0x7   :  { %1116 = vmatpush3.bf16.msra.mxu0 %v1113_v7  ;;  %1125 = vmatpush3.bf16.msra.mxu1 %v1274_v12  ;;  %v31_v22 = vld [vmem:[%s1413_s0 + $0x30] sm:$0xff]  ;;  %vm83_vm4 = vcmask 220160   ;;  %v32_v41 = vld [vmem:[%s1413_s0 + $0x38] sm:$0xff]  ;;  %vm217_vm12 = vcmask 261120   ;;  %v20_v15 = vld [vmem:[%s1414_s1 + $0x40] sm:$0xff]  ;;  %s1230_s22 = smov [#allocation2]  }
   0x8   :  { %1119 = vmatprep.subr.msk.bf16.mxu0 %vm1279_vm2, %v1117_v16  ;;  %1126 = vmatprep.subr.bf16.mxu1 %v1226_v8  ;;  %v34_v24 = vand.u32 127, %v33_v23  ;;  %v22_v17 = vld [vmem:[%s1414_s1 + $0x50] sm:$0xff]  ;;  %s903_s23 = sshll.u32 %s1230_s22, 4  ;;  %vm895_vm14 = vcmask 72704   ;;  %s904_s23 = int_to_ptr.vmem [resolvable:$true] %s903_s23 }
   0x9   :  { %1022 = vmatprep.mubr.msk.f32.mxu1 %vm1228_vm3, %v1229_v21  ;;  %s1201_s24 = scalar_lea.vmem %s904_s23, 128  ;;  %p1206_p1 = scmp.lt.s32.totalorder %s904_s23, %s904_s23 }
   0xa   :  { %48 = vperm.xlu0 %1183, %v29_v18   ;;  %51 = vperm.xlu1 %1184, %v30_v19   ;;  %v23_v19 = vld [vmem:[%s1414_s1 + $0x58] sm:$0xff]  ;;  %p1202_p0 = scmp.ne.s32.totalorder %s904_s23, %s1201_s24  ;;  %p1207_p2 = scmp.lt.s32.totalorder %s1201_s24, %s1201_s24 }
   0xb   :  { %1122 = vmatpush3.bf16.msk.msra.mxu0 %vm1279_vm2, %v1117_v16  ;;  %1128 = vmatpush3.bf16.msra.mxu1 %v1296_v20  ;;  %v21_v16 = vld [vmem:[%s1414_s1 + $0x48] sm:$0xff] }
   0xc   :  { %1129 = vmatprep.subr.bf16.mxu1 %v1226_v8  ;;  %1135 = vmatprep.subr.bf16.mxu0 %v1226_v8  ;;  %v1172_v18 = vpack.c.bf16 %v21_v16, %v20_v15  ;;  %p1208_p3 = por %p1207_p2, %p1206_p1 }
   0xe   :  { %54 = vperm.xlu0 %1183, %v31_v22   ;;  %1023 = vmatmul.mubr.f32.vlgmr.msra.gmra.mrb[0].mxu1 %v1229_v21  ;;  %p1209_p4 = pnand %p1208_p3, %p1202_p0 }
   0xf   :  { %1131 = vmatpush3.bf16.msra.mxu1 %v1274_v12  ;;  %1033 = vmatprep.mubr.msk.f32.mxu1 %vm1228_vm3, %v1229_v21 }
  0x10   :  { %1132 = vmatprep.subr.bf16.mxu1 %v1226_v8  ;;  %57 = vperm.xlu1 %1184, %v32_v41  }
  0x13   :  { %1134 = vmatpush3.bf16.msra.mxu1 %v1296_v20 }
  0x14   :  { %1141 = vmatprep.subr.bf16.mxu1 %v1226_v8 }
  0x81   :  { %v37_v25 = vpop.permute.xlu0 %36  ;;  %v43_v26 = vpop.permute.xlu1 %42 }
  0x82   :  { %vm59_vm5 = vcmp.eq.s32.totalorder %v37_v25, %v34_v24  ;;  %vm61_vm6 = vcmp.eq.s32.totalorder %v43_v26, %v34_v24  ;;  %v935_v25 = vld [vmem:[%s1414_s1 + $0x60] ss:$0 sm:$0xff] }
  0x83   :  { %v911_v27 = vsel %vm59_vm5, 1.0, %v1229_v21  ;;  %v913_v30 = vsel %vm61_vm6, 1.0, %v1229_v21 }
  0x84   :  { %1002 = vmatprep.mubr.msk.f32.mxu0 %vm83_vm4, %v911_v27 }
  0x85   :  { %v40_v28 = vpop.permute.xlu0 %39  ;;  %v46_v29 = vpop.permute.xlu1 %45 }
  0x86   :  { %vm60_vm7 = vcmp.eq.s32.totalorder %v40_v28, %v34_v24  ;;  %vm62_vm8 = vcmp.eq.s32.totalorder %v46_v29, %v34_v24 }
  0x87   :  { %v912_v31 = vsel %vm60_vm7, 1.0, %v1229_v21  ;;  %v914_v32 = vsel %vm62_vm8, 1.0, %v1229_v21 }
  0x88   :  { %1003 = vmatmul.mubr.msk.f32.vlgmr.msra.gmra.mrb[0].mxu0 %vm83_vm4, %v912_v31 }
  0x89   :  { %v49_v33 = vpop.permute.xlu0 %48  ;;  %1005 = vmatprep.mubr.msk.f32.mxu0 %vm83_vm4, %v913_v30  ;;  %v52_v34 = vpop.permute.xlu1 %51  ;;  %1137 = vmatpush3.bf16.msra.mxu0 %v1274_v12 }
  0x8a   :  { %vm63_vm9 = vcmp.eq.s32.totalorder %v49_v33, %v34_v24  ;;  %vm64_vm10 = vcmp.eq.s32.totalorder %v52_v34, %v34_v24  ;;  %1138 = vmatprep.subr.bf16.mxu0 %v1226_v8 }
  0x8b   :  { %v915_v35 = vsel %vm63_vm9, 1.0, %v1229_v21  ;;  %v916_v36 = vsel %vm64_vm10, 1.0, %v1229_v21 }
  0x8c   :  { %1006 = vmatmul.mubr.msk.f32.gmra.mrb[2].mxu0 %vm83_vm4, %v914_v32 }
  0x8d   :  { %v55_v37 = vpop.permute.xlu0 %54  ;;  %1008 = vmatprep.mubr.msk.f32.mxu0 %vm83_vm4, %v915_v35  ;;  %1140 = vmatpush3.bf16.msra.mxu0 %v1296_v20 }
  0x8e   :  { %vm65_vm11 = vcmp.eq.s32.totalorder %v55_v37, %v34_v24  ;;  %1147 = vmatprep.subr.bf16.mxu0 %v1226_v8 }
  0x8f   :  { %v917_v38 = vsel %vm65_vm11, 1.0, %v1229_v21  ;;  %v58_v46 = vpop.permute.xlu1 %57 }
  0x90   :  { %1009 = vmatmul.mubr.msk.f32.gmra.mrb[4].mxu0 %vm83_vm4, %v916_v36  ;;  %vm66_vm13 = vcmp.eq.s32.totalorder %v58_v46, %v34_v24 }
  0x91   :  { %1011 = vmatprep.mubr.msk.f32.mxu0 %vm83_vm4, %v917_v38  ;;  %v918_v47 = vsel %vm66_vm13, 1.0, %v1229_v21 }
  0x94   :  { %1012 = vmatmul.mubr.msk.f32.gmra.mrb[6].mxu0 %vm83_vm4, %v918_v47 }
  0x95   :  { %1044 = vmatprep.mubr.msk.f32.mxu0 %vm1228_vm3, %v1229_v21 }
  0xe1   :  { %v287_v39 = vpop.f32.mrb[0].mxu1 }
  0xe2   :  { %v1024_v40 = vpop.f32.mrb[1].mxu1 }
 0x15b   :  { %v1004_v42 = vpop.f32.mrb[0].mxu0 }
 0x15c   :  { %v178_v43 = vpop.f32.mrb[1].mxu0 }
 0x15d   :  { %v291_v44 = vadd.f32 %v287_v39, %v178_v43 }
 0x15f   :  { %1185 = vtanh.f32 %v291_v44  ;;  %v1007_v48 = vpop.f32.mrb[2].mxu0 }
 0x160   :  { %v188_v49 = vpop.f32.mrb[3].mxu0 }
 0x163   :  { %v1010_v50 = vpop.f32.mrb[4].mxu0 }
 0x164   :  { %v198_v51 = vpop.f32.mrb[5].mxu0 }
 0x167   :  { %v1350_v55 = vpop.f32.mrb[6].mxu0 }
 0x168   :  { %v208_v56 = vpop.f32.mrb[7].mxu0 }
 0x169   :  { %v1186_v45 = vpop.eup %1185 }
 0x16a   :  { %1034 = vmatmul.mubr.msk.f32.vlgmr.msra.gmra.mrb[2].mxu1 %vm217_vm12, %v1186_v45 }
 0x16b   :  { %1143 = vmatpush3.bf16.msra.mxu1 %v1274_v12  ;;  %1055 = vmatprep.mubr.msk.f32.mxu1 %vm1228_vm3, %v1229_v21 }
 0x16c   :  { %1144 = vmatprep.subr.bf16.mxu1 %v1226_v8 }
 0x16f   :  { %1146 = vmatpush3.bf16.msra.mxu1 %v1296_v20 }
 0x170   :  { %1153 = vmatprep.subr.bf16.mxu1 %v1226_v8 }
 0x23d   :  { %v362_v52 = vpop.f32.mrb[2].mxu1 }
 0x23e   :  { %v366_v53 = vadd.f32 %v1004_v42, %v362_v52  ;;  %v1035_v54 = vpop.f32.mrb[3].mxu1 }
 0x240   :  { %1187 = vtanh.f32 %v366_v53 }
 0x24a   :  { %v1188_v57 = vpop.eup %1187 }
 0x24b   :  { %1045 = vmatmul.mubr.msk.f32.vlgmr.msra.gmra.mrb[8].mxu0 %vm217_vm12, %v1188_v57 }
 0x24c   :  { %1149 = vmatpush3.bf16.msra.mxu0 %v1274_v12  ;;  %1066 = vmatprep.mubr.msk.f32.mxu0 %vm1228_vm3, %v1229_v21 }
 0x24d   :  { %1150 = vmatprep.subr.bf16.mxu0 %v1226_v8 }
 0x250   :  { %1152 = vmatpush3.bf16.msra.mxu0 %v1296_v20 }
 0x251   :  { %1159 = vmatprep.subr.bf16.mxu0 %v1226_v8 }
 0x31e   :  { %v437_v58 = vpop.f32.mrb[8].mxu0 }
 0x31f   :  { %v441_v59 = vadd.f32 %v437_v58, %v188_v49  ;;  %v1046_v60 = vpop.f32.mrb[9].mxu0 }
 0x321   :  { %1189 = vtanh.f32 %v441_v59 }
 0x32b   :  { %v1190_v61 = vpop.eup %1189 }
 0x32c   :  { %1056 = vmatmul.mubr.msk.f32.vlgmr.msra.gmra.mrb[4].mxu1 %vm217_vm12, %v1190_v61 }
 0x32d   :  { %1155 = vmatpush3.bf16.msra.mxu1 %v1274_v12  ;;  %1077 = vmatprep.mubr.msk.f32.mxu1 %vm1228_vm3, %v1229_v21 }
 0x32e   :  { %1156 = vmatprep.subr.bf16.mxu1 %v1226_v8 }
 0x331   :  { %1158 = vmatpush3.bf16.msra.mxu1 %v1296_v20 }
 0x332   :  { %1165 = vmatprep.subr.bf16.mxu1 %v1226_v8 }
 0x3ff   :  { %v512_v62 = vpop.f32.mrb[4].mxu1 }
 0x400   :  { %v516_v63 = vadd.f32 %v1007_v48, %v512_v62  ;;  %v1057_v0 = vpop.f32.mrb[5].mxu1 }
 0x402   :  { %1191 = vtanh.f32 %v516_v63 }
 0x40c   :  { %v1192_v1 = vpop.eup %1191 }
 0x40d   :  { %1067 = vmatmul.mubr.msk.f32.vlgmr.msra.gmra.mrb[10].mxu0 %vm217_vm12, %v1192_v1 }
 0x40e   :  { %1161 = vmatpush3.bf16.msra.mxu0 %v1274_v12  ;;  %1088 = vmatprep.mubr.msk.f32.mxu0 %vm1228_vm3, %v1229_v21 }
 0x40f   :  { %1162 = vmatprep.subr.bf16.mxu0 %v1226_v8 }
 0x412   :  { %1164 = vmatpush3.bf16.msra.mxu0 %v1296_v20 }
 0x413   :  { %1171 = vmatprep.subr.bf16.mxu0 %v1226_v8 }
 0x4e0   :  { %v587_v2 = vpop.f32.mrb[10].mxu0 }
 0x4e1   :  { %v591_v3 = vadd.f32 %v587_v2, %v198_v51  ;;  %v1068_v4 = vpop.f32.mrb[11].mxu0 }
 0x4e3   :  { %1193 = vtanh.f32 %v591_v3 }
 0x4ed   :  { %v1194_v5 = vpop.eup %1193 }
 0x4ee   :  { %1078 = vmatmul.mubr.msk.f32.vlgmr.msra.gmra.mrb[6].mxu1 %vm217_vm12, %v1194_v5 }
 0x4ef   :  { %1167 = vmatpush3.bf16.msra.mxu1 %v1274_v12  ;;  %1099 = vmatprep.mubr.msk.f32.mxu1 %vm1228_vm3, %v1229_v21 }
 0x4f0   :  { %1168 = vmatprep.subr.bf16.mxu1 %v1226_v8 }
 0x4f3   :  { %1170 = vmatpush3.bf16.msra.mxu1 %v1296_v20  ;;  %v1175_v20 = vpack.c.bf16 %v23_v19, %v22_v17 }
 0x5c1   :  { %v662_v6 = vpop.f32.mrb[6].mxu1 }
 0x5c2   :  { %v666_v7 = vadd.f32 %v1010_v50, %v662_v6  ;;  %v1079_v9 = vpop.f32.mrb[7].mxu1 }
 0x5c4   :  { %1195 = vtanh.f32 %v666_v7 }
 0x5ce   :  { %v1196_v10 = vpop.eup %1195 }
 0x5cf   :  { %1089 = vmatmul.mubr.msk.f32.vlgmr.msra.gmra.mrb[12].mxu0 %vm217_vm12, %v1196_v10 }
 0x5d0   :  { %1110 = vmatprep.mubr.msk.f32.mxu0 %vm1228_vm3, %v1229_v21  ;;  %1173 = vmatpush3.bf16.msra.mxu0 %v1172_v18 }
 0x5d1   :  { %1174 = vmatprep.subr.bf16.mxu0 %v1226_v8 }
 0x5d4   :  { %1176 = vmatpush3.bf16.msra.mxu0 %v1175_v20 }
 0x6a2   :  { %v737_v11 = vpop.f32.mrb[12].mxu0 }
 0x6a3   :  { %v741_v13 = vadd.f32 %v737_v11, %v208_v56  ;;  %v1090_v12 = vpop.f32.mrb[13].mxu0 }
 0x6a5   :  { %1197 = vtanh.f32 %v741_v13 }
 0x6af   :  { %v1198_v14 = vpop.eup %1197 }
 0x6b0   :  { %1100 = vmatmul.mubr.msk.f32.vlgmr.msra.gmra.mrb[8].mxu1 %vm217_vm12, %v1198_v14 }
 0x783   :  { %v812_v21 = vpop.f32.mrb[8].mxu1 }
 0x784   :  { %v816_v22 = vadd.f32 %v1350_v55, %v812_v21  ;;  %v1101_v23 = vpop.f32.mrb[9].mxu1 }
 0x786   :  { %1199 = vtanh.f32 %v816_v22 }
 0x790   :  { %v1200_v24 = vpop.eup %1199 }
 0x791   :  { %1111 = vmatmul.mubr.msk.f32.vlgmr.msra.gmra.mrb[14].mxu0 %vm217_vm12, %v1200_v24 }
 0x864   :  { %v891_v26 = vpop.f32.mrb[14].mxu0 }
 0x865   :  { %v892_v27 = vadd.f32 %v935_v25, %v891_v26  ;;  %v1112_v28 = vpop.f32.mrb[15].mxu0 }
 0x867   :  { %896 = vst.msk [vmem:[#allocation2] sm:$0xff] %vm895_vm14, %v892_v27 }
 0x868   :  { %1212 = shalt.err (!%p1209_p4)
}
 0x869   :  { %s1213_s27 = scalar_lea.hbm %s1415_s2, 128 }
 0x86a   :  { %p1214_p5 = scmp.ne.s32.totalorder %s1415_s2, %s1213_s27  ;;  %p1217_p6 = scmp.lt.u32.totalorder %s1213_s27, %s1415_s2 }
 0x86c   :  { %p1219_p7 = pnand %p1217_p6, %p1214_p5 }
 0x86e   :  { %1222 = shalt.err (!%p1219_p7)
}
 0x86f   :  { %906 = dma.vmem_to_hbm [thread:$0]  %s904_s23, 128, %s1415_s2, [#allocation3]  }
 0x870   :  { %1223 = dma.done.wait [#allocation3], 128  }
 0x871   :  { %1224 = vsyncadd [#allocation3], 4294967168 }
 0x872   :  { %910 = vsyncpa [#allocation3], 1 }

</bundles_post_ra>
